<compile_context>
chip_gen: v7x
topology: tpu7x:2x2x1
jax: 0.10.0
libtpu: 0.0.40
codegen_flags: <defaults>
</compile_context>

<pallas_src>
import functools

import jax
import jax.numpy as jnp
from jax.experimental import pallas as pl
from jax.experimental.pallas import tpu as pltpu

LANES = 128
SUBLANES = 8
NEG_MASK = -1e30  # large negative bias for padded softmax columns


def _round_up(x, m):
    return (x + m - 1) // m * m


def _decoder_kernel(x_ref, w1_ref, b12_ref, w2_ref, w34_ref, b34_ref, out_ref,
                    *, obs_pad):
    x = x_ref[...]

    # fc1 + relu
    h = jnp.dot(x, w1_ref[...], preferred_element_type=jnp.float32)
    h = jnp.maximum(h + b12_ref[0:1, :], 0.0)

    # fc2 + relu
    h = jnp.dot(h, w2_ref[...], preferred_element_type=jnp.float32)
    h = jnp.maximum(h + b12_ref[1:2, :], 0.0)

    # fused fc3 || fc4 : one MXU push for both heads
    fused = jnp.dot(h, w34_ref[...], preferred_element_type=jnp.float32)
    fused = fused + b34_ref[...]

    # obs head: first obs_pad lanes (lane-aligned static slice)
    obs = fused[:, :obs_pad]

    # act head: remaining lanes; padded columns have bias -1e30 -> exp -> 0
    logits = fused[:, obs_pad:]
    m = jnp.max(logits, axis=-1, keepdims=True)
    e = jnp.exp(logits - m)
    denom = jnp.sum(e, axis=-1, keepdims=True)
    # Exact divide: approx vrcp (pl.reciprocal(approx=True)) drifts the row
    # sums off 1.0 by ~1e-3; the exact path costs only a few VALU ops/vreg.
    act = e / denom

    # two unmasked, 128-aligned stores into one lane-dense output slab
    out_ref[:, :obs_pad] = obs.astype(out_ref.dtype)
    out_ref[:, obs_pad:] = act.astype(out_ref.dtype)


def linear_decoder(x, params, *, tile_b=512):
    """Fused LinearDecoder forward.

    x: [B, input_dim] float32
    params: dict with w1..w4 stored as (in, out) and b1..b4 as (1, out)
    returns (out_obs [B, output_obs_dim], out_act [B, output_act_dim])
    """
    B, input_dim = x.shape
    hidden_dim = params["w1"].shape[1]
    obs_dim = params["w3"].shape[1]
    act_dim = params["w4"].shape[1]

    obs_pad = _round_up(obs_dim, LANES)
    act_pad = _round_up(act_dim, LANES)
    out_pad = obs_pad + act_pad

    # --- pack weights/biases (wrapper-side, traced once under jit) ---------
    w34 = jnp.zeros((hidden_dim, out_pad), jnp.float32)
    w34 = w34.at[:, :obs_dim].set(params["w3"].astype(jnp.float32))
    w34 = w34.at[:, obs_pad:obs_pad + act_dim].set(params["w4"].astype(jnp.float32))

    b34 = jnp.zeros((1, out_pad), jnp.float32)
    b34 = b34.at[:, :obs_dim].set(params["b3"].astype(jnp.float32))
    b34 = b34.at[:, obs_pad:].set(NEG_MASK)          # mask padded softmax lanes
    b34 = b34.at[:, obs_pad:obs_pad + act_dim].set(params["b4"].astype(jnp.float32))

    b12 = jnp.concatenate(
        [params["b1"].astype(jnp.float32), params["b2"].astype(jnp.float32)], axis=0
    )  # (2, hidden)

    # --- batch tiling -------------------------------------------------------
    tile_b = min(tile_b, _round_up(B, SUBLANES))
    b_padded = _round_up(B, tile_b)
    if b_padded != B:
        x = jnp.pad(x, ((0, b_padded - B), (0, 0)))
    grid = (b_padded // tile_b,)

    flops = 2 * b_padded * (input_dim * hidden_dim
                            + hidden_dim * hidden_dim
                            + hidden_dim * out_pad)
    bytes_accessed = 4 * (x.size + params["w1"].size + b12.size
                          + params["w2"].size + w34.size + b34.size
                          + b_padded * out_pad)
    transcendentals = b_padded * act_pad  # exp per softmax element

    kernel = functools.partial(_decoder_kernel, obs_pad=obs_pad)

    out = pl.pallas_call(
        kernel,
        out_shape=jax.ShapeDtypeStruct((b_padded, out_pad), jnp.float32),
        grid_spec=pltpu.PrefetchScalarGridSpec(
            num_scalar_prefetch=0,
            grid=grid,
            in_specs=[
                # x tile marches over the batch; weights/biases stay resident.
                pl.BlockSpec((tile_b, input_dim), lambda i: (i, 0)),
                pl.BlockSpec((input_dim, hidden_dim), lambda i: (0, 0)),
                pl.BlockSpec((2, hidden_dim), lambda i: (0, 0)),
                pl.BlockSpec((hidden_dim, hidden_dim), lambda i: (0, 0)),
                pl.BlockSpec((hidden_dim, out_pad), lambda i: (0, 0)),
                pl.BlockSpec((1, out_pad), lambda i: (0, 0)),
            ],
            out_specs=pl.BlockSpec((tile_b, out_pad), lambda i: (i, 0)),
        ),
        compiler_params=pltpu.CompilerParams(
            dimension_semantics=("parallel",),  # megacore sharding on v7x
        ),
        cost_estimate=pl.CostEstimate(
            flops=flops,
            transcendentals=transcendentals,
            bytes_accessed=bytes_accessed,
        ),
    )(x, params["w1"], b12, params["w2"], w34, b34)

    out_obs = out[:B, :obs_dim]
    out_act = out[:B, obs_pad:obs_pad + act_dim]
    return out_obs, out_act


def init_params(key, input_dim, hidden_dim, output_obs_dim, output_act_dim):
    """Deterministic synthetic parameters (shapes match nn.Linear layers)."""
    ks = jax.random.split(key, 8)

    def lin(kw, kb, fan_in, fan_out):
        bound = 1.0 / jnp.sqrt(fan_in)
        w = jax.random.uniform(kw, (fan_in, fan_out), jnp.float32, -bound, bound)
        b = jax.random.uniform(kb, (1, fan_out), jnp.float32, -bound, bound)
        return w, b

    w1, b1 = lin(ks[0], ks[1], input_dim, hidden_dim)
    w2, b2 = lin(ks[2], ks[3], hidden_dim, hidden_dim)
    w3, b3 = lin(ks[4], ks[5], hidden_dim, output_obs_dim)
    w4, b4 = lin(ks[6], ks[7], hidden_dim, output_act_dim)
    return dict(w1=w1, b1=b1, w2=w2, b2=b2, w3=w3, b3=b3, w4=w4, b4=b4)


def _reference(x, p):
    h = jnp.maximum(x @ p["w1"] + p["b1"], 0.0)
    h = jnp.maximum(h @ p["w2"] + p["b2"], 0.0)
    out_obs = h @ p["w3"] + p["b3"]
    out_act = jax.nn.softmax(h @ p["w4"] + p["b4"], axis=-1)
    return out_obs, out_act


if __name__ == "__main__":
    key = jax.random.PRNGKey(0)
    B, input_dim, hidden_dim = 8, 16, 32
    output_obs_dim, output_act_dim = 12, 6

    kx, kp = jax.random.split(key)
    x = jax.random.normal(kx, (B, input_dim), jnp.float32)
    params = init_params(kp, input_dim, hidden_dim, output_obs_dim, output_act_dim)

    out_obs, out_act = linear_decoder(x, params)
    jax.block_until_ready((out_obs, out_act))

    ref_obs, ref_act = _reference(x, params)
    assert out_obs.shape == (B, output_obs_dim)
    assert out_act.shape == (B, output_act_dim)
    # obs path is plain f32 matmul chain -> tight tolerance.
    assert jnp.allclose(out_obs, ref_obs, atol=1e-4, rtol=1e-4)
    # act path now uses an exact softmax denominator.
    assert jnp.allclose(out_act, ref_act, atol=1e-4, rtol=1e-4)
    assert jnp.allclose(jnp.sum(out_act, axis=-1), 1.0, atol=1e-3)

    print("KERNEL_OK")
</pallas_src>

<mosaic_0001>
module attributes {stable_mosaic.version = 11 : i64} {
  func.func @_decoder_kernel(%arg0: i32, %arg1: memref<8x16xf32, #tpu.memory_space<vmem>>, %arg2: memref<16x32xf32, #tpu.memory_space<vmem>>, %arg3: memref<2x32xf32, #tpu.memory_space<vmem>>, %arg4: memref<32x32xf32, #tpu.memory_space<vmem>>, %arg5: memref<32x256xf32, #tpu.memory_space<vmem>>, %arg6: memref<1x256xf32, #tpu.memory_space<vmem>>, %arg7: memref<8x256xf32, #tpu.memory_space<vmem>>) attributes {dimension_semantics = [#tpu.dimension_semantics<parallel>], iteration_bounds = array<i64: 1>, scalar_prefetch = 0 : i64, scratch_operands = 0 : i64, tpu.core_type = #tpu.core_type<tc>, window_params = [{transform_indices = @transform_0, window_bounds = array<i64: 8, 16>}, {pipeline_mode = #tpu.pipeline_mode<synchronous>, transform_indices = @transform_1, window_bounds = array<i64: 16, 32>}, {pipeline_mode = #tpu.pipeline_mode<synchronous>, transform_indices = @transform_2, window_bounds = array<i64: 2, 32>}, {pipeline_mode = #tpu.pipeline_mode<synchronous>, transform_indices = @transform_3, window_bounds = array<i64: 32, 32>}, {pipeline_mode = #tpu.pipeline_mode<synchronous>, transform_indices = @transform_4, window_bounds = array<i64: 32, 256>}, {pipeline_mode = #tpu.pipeline_mode<synchronous>, transform_indices = @transform_5, window_bounds = array<i64: 1, 256>}, {transform_indices = @transform_6, window_bounds = array<i64: 8, 256>}]} {
    %c0 = arith.constant 0 : index
    %c0_0 = arith.constant 0 : index
    %0 = vector.load %arg1[%c0, %c0_0] : memref<8x16xf32, #tpu.memory_space<vmem>>, vector<8x16xf32>
    %c0_1 = arith.constant 0 : index
    %c0_2 = arith.constant 0 : index
    %1 = vector.load %arg2[%c0_1, %c0_2] : memref<16x32xf32, #tpu.memory_space<vmem>>, vector<16x32xf32>
    %cst = arith.constant dense<0.000000e+00> : vector<8x32xf32>
    %2 = tpu.matmul %0, %1, %cst {dimension_numbers = #tpu.dot_dimension_numbers<[1], [0], [0], [1], [0, 0, 1, 1], [], []>} : vector<8x16xf32>, vector<16x32xf32>, vector<8x32xf32> -> vector<8x32xf32>
    %c0_3 = arith.constant 0 : index
    %c0_4 = arith.constant 0 : index
    %3 = vector.load %arg3[%c0_3, %c0_4] : memref<2x32xf32, #tpu.memory_space<vmem>>, vector<1x32xf32>
    %4 = vector.broadcast %3 : vector<1x32xf32> to vector<8x32xf32>
    %5 = arith.addf %2, %4 : vector<8x32xf32>
    %cst_5 = arith.constant 0.000000e+00 : f32
    %6 = vector.broadcast %cst_5 : f32 to vector<8x32xf32>
    %7 = arith.maximumf %5, %6 : vector<8x32xf32>
    %c0_6 = arith.constant 0 : index
    %c0_7 = arith.constant 0 : index
    %8 = vector.load %arg4[%c0_6, %c0_7] : memref<32x32xf32, #tpu.memory_space<vmem>>, vector<32x32xf32>
    %cst_8 = arith.constant dense<0.000000e+00> : vector<8x32xf32>
    %9 = tpu.matmul %7, %8, %cst_8 {dimension_numbers = #tpu.dot_dimension_numbers<[1], [0], [0], [1], [0, 0, 1, 1], [], []>} : vector<8x32xf32>, vector<32x32xf32>, vector<8x32xf32> -> vector<8x32xf32>
    %c1 = arith.constant 1 : index
    %c0_9 = arith.constant 0 : index
    %10 = vector.load %arg3[%c1, %c0_9] : memref<2x32xf32, #tpu.memory_space<vmem>>, vector<1x32xf32>
    %11 = vector.broadcast %10 : vector<1x32xf32> to vector<8x32xf32>
    %12 = arith.addf %9, %11 : vector<8x32xf32>
    %cst_10 = arith.constant 0.000000e+00 : f32
    %13 = vector.broadcast %cst_10 : f32 to vector<8x32xf32>
    %14 = arith.maximumf %12, %13 : vector<8x32xf32>
    %c0_11 = arith.constant 0 : index
    %c0_12 = arith.constant 0 : index
    %15 = vector.load %arg5[%c0_11, %c0_12] : memref<32x256xf32, #tpu.memory_space<vmem>>, vector<32x256xf32>
    %cst_13 = arith.constant dense<0.000000e+00> : vector<8x256xf32>
    %16 = tpu.matmul %14, %15, %cst_13 {dimension_numbers = #tpu.dot_dimension_numbers<[1], [0], [0], [1], [0, 0, 1, 1], [], []>} : vector<8x32xf32>, vector<32x256xf32>, vector<8x256xf32> -> vector<8x256xf32>
    %c0_14 = arith.constant 0 : index
    %c0_15 = arith.constant 0 : index
    %17 = vector.load %arg6[%c0_14, %c0_15] : memref<1x256xf32, #tpu.memory_space<vmem>>, vector<1x256xf32>
    %18 = vector.broadcast %17 : vector<1x256xf32> to vector<8x256xf32>
    %19 = arith.addf %16, %18 : vector<8x256xf32>
    %20 = vector.extract_strided_slice %19 {offsets = [0, 0], sizes = [8, 128], strides = [1, 1]} : vector<8x256xf32> to vector<8x128xf32>
    %21 = vector.extract_strided_slice %19 {offsets = [0, 128], sizes = [8, 128], strides = [1, 1]} : vector<8x256xf32> to vector<8x128xf32>
    %cst_16 = arith.constant dense<0xFF800000> : vector<8xf32>
    %22 = vector.multi_reduction <maximumf>, %21, %cst_16 [1] : vector<8x128xf32> to vector<8xf32>
    %23 = vector.shape_cast %22 : vector<8xf32> to vector<8x1xf32>
    %24 = vector.broadcast %23 : vector<8x1xf32> to vector<8x128xf32>
    %25 = arith.subf %21, %24 : vector<8x128xf32>
    %26 = math.exp %25 : vector<8x128xf32>
    %cst_17 = arith.constant dense<0.000000e+00> : vector<8xf32>
    %27 = vector.multi_reduction <add>, %26, %cst_17 [1] : vector<8x128xf32> to vector<8xf32>
    %28 = vector.shape_cast %27 : vector<8xf32> to vector<8x1xf32>
    %29 = vector.broadcast %28 : vector<8x1xf32> to vector<8x128xf32>
    %30 = arith.divf %26, %29 : vector<8x128xf32>
    %c0_18 = arith.constant 0 : index
    %c0_19 = arith.constant 0 : index
    %31 = vector.load %arg7[%c0_18, %c0_19] : memref<8x256xf32, #tpu.memory_space<vmem>>, vector<8x128xf32>
    tpu.vector_store %arg7[%c0_18, %c0_19], %20 {strides = array<i32>} : memref<8x256xf32, #tpu.memory_space<vmem>>, vector<8x128xf32>,
    %c0_20 = arith.constant 0 : index
    %c128 = arith.constant 128 : index
    %32 = vector.load %arg7[%c0_20, %c128] : memref<8x256xf32, #tpu.memory_space<vmem>>, vector<8x128xf32>
    tpu.vector_store %arg7[%c0_20, %c128], %30 {strides = array<i32>} : memref<8x256xf32, #tpu.memory_space<vmem>>, vector<8x128xf32>,
    return
  }
  func.func @transform_0(%arg0: i32) -> (i32, i32) {
    %c0_i32 = arith.constant 0 : i32
    %c0_i32_0 = arith.constant 0 : i32
    return %arg0, %c0_i32 : i32, i32
  }
  func.func @transform_1(%arg0: i32) -> (i32, i32) {
    %c0_i32 = arith.constant 0 : i32
    %c0_i32_0 = arith.constant 0 : i32
    %c0_i32_1 = arith.constant 0 : i32
    return %c0_i32, %c0_i32_0 : i32, i32
  }
  func.func @transform_2(%arg0: i32) -> (i32, i32) {
    %c0_i32 = arith.constant 0 : i32
    %c0_i32_0 = arith.constant 0 : i32
    %c0_i32_1 = arith.constant 0 : i32
    return %c0_i32, %c0_i32_0 : i32, i32
  }
  func.func @transform_3(%arg0: i32) -> (i32, i32) {
    %c0_i32 = arith.constant 0 : i32
    %c0_i32_0 = arith.constant 0 : i32
    %c0_i32_1 = arith.constant 0 : i32
    return %c0_i32, %c0_i32_0 : i32, i32
  }
  func.func @transform_4(%arg0: i32) -> (i32, i32) {
    %c0_i32 = arith.constant 0 : i32
    %c0_i32_0 = arith.constant 0 : i32
    %c0_i32_1 = arith.constant 0 : i32
    return %c0_i32, %c0_i32_0 : i32, i32
  }
  func.func @transform_5(%arg0: i32) -> (i32, i32) {
    %c0_i32 = arith.constant 0 : i32
    %c0_i32_0 = arith.constant 0 : i32
    %c0_i32_1 = arith.constant 0 : i32
    return %c0_i32, %c0_i32_0 : i32, i32
  }
  func.func @transform_6(%arg0: i32) -> (i32, i32) {
    %c0_i32 = arith.constant 0 : i32
    %c0_i32_0 = arith.constant 0 : i32
    return %arg0, %c0_i32 : i32, i32
  }
}

</mosaic_0001>

<bundles_post_ra>
// kernel: tpu_custom_call.1
= control target key start
LH: loop header
LB: loop body
LE: loop exit
PB: predicated region body
PF: predicated region fallthrough
CT: control target
= control target key end

     0   :  { %11 = vsyncpa [#allocation3], 0  ;;  %s672_s0 = inlined_call_operand.hbm [shape: f32[8,16], index: 0, kind: input, shape index: {}]   ;;  %s673_s1 = inlined_call_operand.hbm [shape: f32[16,32], index: 1, kind: input, shape index: {}]   ;;  %s674_s2 = inlined_call_operand.vmem [shape: f32[2,32], index: 2, kind: input, shape index: {}]   ;;  %s675_s3 = inlined_call_operand.hbm [shape: f32[32,32], index: 3, kind: input, shape index: {}]   ;;  %s676_s4 = inlined_call_operand.hbm [shape: f32[32,256], index: 4, kind: input, shape index: {}]   ;;  %s677_s5 = inlined_call_operand.vmem [shape: f32[1,256], index: 5, kind: input, shape index: {}]   ;;  %s678_s6 = inlined_call_operand.hbm [shape: f32[8,256], index: 6, kind: output, shape index: {}]  }
   0x1   :  { %12 = vsyncpa [#allocation6], 0 }
   0x2   :  { %13 = vsyncpa [#allocation9], 0 }
   0x3   :  { %14 = vsyncpa [#allocation4], 0  ;;  %s548_s21 = smov [#allocation5]   ;;  %s430_s25 = scalar_lea.hbm %s673_s1, 256 }
   0x4   :  { %s30_s22 = sshll.u32 %s548_s21, 4  ;;  %p431_p0 = scmp.ne.s32.totalorder %s673_s1, %s430_s25  ;;  %s31_s22 = int_to_ptr.vmem [resolvable:$true] %s30_s22 }
   0x5   :  { %p434_p1 = scmp.lt.u32.totalorder %s430_s25, %s673_s1 }
   0x7   :  { %p436_p2 = pnand %p434_p1, %p431_p0 }
   0x9   :  { %439 = shalt.err (!%p436_p2)
}
   0xa   :  { %s440_s30 = scalar_lea.vmem %s31_s22, 256  ;;  %p445_p4 = scmp.lt.s32.totalorder %s31_s22, %s31_s22 }
   0xb   :  { %p441_p3 = scmp.ne.s32.totalorder %s31_s22, %s440_s30  ;;  %p446_p5 = scmp.lt.s32.totalorder %s440_s30, %s440_s30 }
   0xd   :  { %p447_p6 = por %p446_p5, %p445_p4 }
   0xf   :  { %p448_p7 = pnand %p447_p6, %p441_p3 }
  0x11   :  { %451 = shalt.err (!%p448_p7)
}
  0x12   :  { %s549_s7 = smov 128   ;;  %s550_s8 = smov 8  }
  0x13   :  { %36 = dma.hbm_to_vmem [thread:$0]  %s673_s1, 256, %s31_s22, [#allocation6], %s549_s7, %s549_s7, %s550_s8  }
  0x14   :  { %s551_s11 = smov [#allocation2]   ;;  %s552_s13 = smov [#allocation7]  }
  0x15   :  { %s21_s12 = sshll.u32 %s551_s11, 4  ;;  %s44_s14 = sshll.u32 %s552_s13, 4  ;;  %s22_s12 = int_to_ptr.vmem [resolvable:$true] %s21_s12  ;;  %s45_s14 = int_to_ptr.vmem [resolvable:$true] %s44_s14 }
  0x16   :  { %s452_s17 = scalar_lea.hbm %s672_s0, 128 }
  0x17   :  { %p453_p8 = scmp.ne.s32.totalorder %s672_s0, %s452_s17  ;;  %p456_p9 = scmp.lt.u32.totalorder %s452_s17, %s672_s0 }
  0x19   :  { %p458_p10 = pnand %p456_p9, %p453_p8 }
  0x1b   :  { %461 = shalt.err (!%p458_p10)
}
  0x1c   :  { %s462_s1 = scalar_lea.vmem %s22_s12, 128  ;;  %p467_p12 = scmp.lt.s32.totalorder %s22_s12, %s22_s12 }
  0x1d   :  { %p463_p11 = scmp.ne.s32.totalorder %s22_s12, %s462_s1  ;;  %p468_p13 = scmp.lt.s32.totalorder %s462_s1, %s462_s1 }
  0x1f   :  { %p469_p0 = por %p468_p13, %p467_p12 }
  0x21   :  { %p470_p1 = pnand %p469_p0, %p463_p11 }
  0x23   :  { %473 = shalt.err (!%p470_p1)
}
  0x24   :  { %24 = dma.hbm_to_vmem [thread:$0]  %s672_s0, 128, %s22_s12, [#allocation3]  }
  0x25   :  { %s474_s26 = scalar_lea.hbm %s675_s3, 512 }
  0x26   :  { %p475_p2 = scmp.ne.s32.totalorder %s675_s3, %s474_s26  ;;  %p478_p3 = scmp.lt.u32.totalorder %s474_s26, %s675_s3 }
  0x28   :  { %p480_p4 = pnand %p478_p3, %p475_p2 }
  0x2a   :  { %483 = shalt.err (!%p480_p4)
}
  0x2b   :  { %s484_s9 = scalar_lea.vmem %s45_s14, 512  ;;  %p489_p6 = scmp.lt.s32.totalorder %s45_s14, %s45_s14 }
  0x2c   :  { %p485_p5 = scmp.ne.s32.totalorder %s45_s14, %s484_s9  ;;  %p490_p7 = scmp.lt.s32.totalorder %s484_s9, %s484_s9 }
  0x2e   :  { %p491_p8 = por %p490_p7, %p489_p6 }
  0x30   :  { %p492_p9 = pnand %p491_p8, %p485_p5 }
  0x32   :  { %495 = shalt.err (!%p492_p9)
}
  0x33   :  { %50 = dma.hbm_to_vmem [thread:$0]  %s675_s3, 512, %s45_s14, [#allocation6], %s549_s7, %s549_s7, %s550_s8  }
  0x34   :  { %s553_s11 = smov [#allocation8]   ;;  %s496_s16 = scalar_lea.hbm %s676_s4, 1024 }
  0x35   :  { %s56_s12 = sshll.u32 %s553_s11, 4  ;;  %p497_p10 = scmp.ne.s32.totalorder %s676_s4, %s496_s16  ;;  %s57_s12 = int_to_ptr.vmem [resolvable:$true] %s56_s12 }
  0x36   :  { %p500_p11 = scmp.lt.u32.totalorder %s496_s16, %s676_s4 }
  0x38   :  { %p502_p12 = pnand %p500_p11, %p497_p10 }
  0x3a   :  { %505 = shalt.err (!%p502_p12)
}
  0x3b   :  { %s506_s21 = scalar_lea.vmem %s57_s12, 1024  ;;  %p511_p0 = scmp.lt.s32.totalorder %s57_s12, %s57_s12 }
  0x3c   :  { %p507_p13 = scmp.ne.s32.totalorder %s57_s12, %s506_s21  ;;  %p512_p1 = scmp.lt.s32.totalorder %s506_s21, %s506_s21 }
  0x3e   :  { %p513_p2 = por %p512_p1, %p511_p0 }
  0x40   :  { %p514_p3 = pnand %p513_p2, %p507_p13 }
  0x42   :  { %517 = shalt.err (!%p514_p3)
}
  0x43   :  { %s554_s3 = smov 256   ;;  %s555_s7 = smov 16  }
  0x44   :  { %62 = dma.hbm_to_vmem [thread:$0]  %s676_s4, 1024, %s57_s12, [#allocation9], %s554_s3, %s554_s3, %s555_s7  }
  0x45   :  { %540 = dma.done.wait [#allocation3], 128  }
  0x46   :  { %541 = vsyncadd [#allocation3], 4294967168 }
  0x47   :  { %542 = dma.done.wait [#allocation6], 768  }
  0x48   :  { %543 = vsyncadd [#allocation6], 4294966528 }
  0x49   :  { %544 = dma.done.wait [#allocation9], 1024  }
  0x4a   :  { %545 = vsyncadd [#allocation9], 4294966272  ;;  %v556_v0 = vmov 0.0|0.0   ;;  %vm557_vm0 = vmmov 0   ;;  %v558_v1 = vmov 0.0   ;;  %v78_v2 = vld [vmem:[#allocation5] sm:$0xff]  ;;  %v254_v34 = vlaneseq }
  0x4b   :  { %397 = vmatprep.subr.bf16.mxu0 %v556_v0  ;;  %383 = vmatprep.mubr.msk.f32.mxu0 %vm557_vm0, %v558_v1  ;;  %v79_v3 = vld [vmem:[#allocation5 + $0x8] sm:$0xff]  ;;  %v160_v5 = vld [vmem:[#allocation7] sm:$0xff]  ;;  %v161_v6 = vld [vmem:[#allocation7 + $0x8] sm:$0xff]  ;;  %vm85_vm1 = vcmask 130048   ;;  %vm169_vm2 = vcmask 261120  }
  0x4c   :  { %400 = vmatprep.subr.bf16.mxu1 %v556_v0  ;;  %394 = vmatprep.mubr.msk.f32.mxu1 %vm557_vm0, %v558_v1  ;;  %v398_v4 = vpack.c.bf16 %v79_v3, %v78_v2  ;;  %v401_v7 = vpack.c.bf16 %v161_v6, %v160_v5  ;;  %v77_v8 = vld [vmem:[#allocation2] sm:$0xff]  ;;  %v162_v9 = vld [vmem:[#allocation7 + $0x10] sm:$0xff]  ;;  %v163_v10 = vld [vmem:[#allocation7 + $0x18] sm:$0xff]  ;;  %v255_v35 = vshrl.u32 %v254_v34, 7 }
  0x4d   :  { %v404_v11 = vpack.c.bf16 %v163_v10, %v162_v9  ;;  %v245_v12 = vld [vmem:[#allocation8 + $0x8] sm:$0xff]  ;;  %v247_v13 = vld [vmem:[#allocation8 + $0x18] sm:$0xff]  ;;  %v244_v14 = vld [vmem:[#allocation8] sm:$0xff] }
  0x4e   :  { %399 = vmatpush3.bf16.msra.mxu0 %v398_v4  ;;  %402 = vmatpush3.bf16.msra.mxu1 %v401_v7  ;;  %v406_v15 = vpack.c.bf16 %v247_v13, %v245_v12  ;;  %v246_v16 = vld [vmem:[#allocation8 + $0x10] sm:$0xff]  ;;  %v366_v18 = vld [vmem:[%s674_s2] ss:$0 sm:$0xff]  ;;  %v251_v24 = vld [vmem:[#allocation8 + $0x38] sm:$0xff]  ;;  %v256_v36 = vsub.s32 0, %v255_v35  ;;  %v260_v38 = vsub.s32 1, %v255_v35 }
  0x4f   :  { %403 = vmatprep.subr.bf16.mxu1 %v556_v0  ;;  %v408_v17 = vpack.c.bf16 %v246_v16, %v244_v14  ;;  %v249_v23 = vld [vmem:[#allocation8 + $0x28] sm:$0xff]  ;;  %v248_v26 = vld [vmem:[#allocation8 + $0x20] sm:$0xff]  ;;  %v250_v27 = vld [vmem:[#allocation8 + $0x30] sm:$0xff] }
  0x50   :  { %407 = vmatprep.subr.bf16.mxu0 %v406_v15  ;;  %v410_v25 = vpack.c.bf16 %v251_v24, %v249_v23  ;;  %v412_v28 = vpack.c.bf16 %v250_v27, %v248_v26  ;;  %v368_v29 = vld [vmem:[%s674_s2 + $0x1] ss:$0 sm:$0xff]  ;;  %s559_s2 = smov [#allocation10]  }
  0x51   :  { %384 = vmatmul.mubr.msk.f32.vlgmr.msra.gmra.mrb[0].mxu0 %vm85_vm1, %v77_v8  ;;  %v252_v37 = vld [vmem:[%s677_s5] sm:$0x3]  ;;  %s355_s26 = sshll.u32 %s559_s2, 4  ;;  %s356_s26 = int_to_ptr.vmem [resolvable:$true] %s355_s26 }
  0x52   :  { %331 = vmatprep.mubr.f32.mxu0 %v558_v1  ;;  %405 = vmatpush3.bf16.msra.mxu1 %v404_v11  ;;  %v257_v39 = vrot.slane %v252_v37, %v256_v36  ;;  %v261_v40 = vrot.slane %v252_v37, %v260_v38  ;;  %s518_s5 = scalar_lea.vmem %s356_s26, 256  ;;  %p523_p5 = scmp.lt.s32.totalorder %s356_s26, %s356_s26 }
  0x53   :  { %409 = vmatpush1.bf16.msra.mxu0 %v408_v17  ;;  %p519_p4 = scmp.ne.s32.totalorder %s356_s26, %s518_s5  ;;  %p524_p6 = scmp.lt.s32.totalorder %s518_s5, %s518_s5 }
  0x54   :  { %411 = vmatprep.subr.bf16.mxu0 %v410_v25 }
  0x55   :  { %p525_p7 = por %p524_p6, %p523_p5 }
  0x57   :  { %413 = vmatpush1.bf16.msra.mxu0 %v412_v28  ;;  %p526_p8 = pnand %p525_p7, %p519_p4 }
 0x124   :  { %v155_v19 = vpop.f32.mrb[0].mxu0 }
 0x125   :  { %v156_v20 = vadd.f32 %v366_v18, %v155_v19  ;;  %v385_v21 = vpop.f32.mrb[1].mxu0 }
 0x127   :  { %v159_v22 = vmax.f32 %v156_v20, 0.0 }
 0x129   :  { %395 = vmatmul.mubr.msk.f32.vlgmr.msra.gmra.mrb[0].mxu1 %vm169_vm2, %v159_v22 }
 0x1fc   :  { %v239_v30 = vpop.f32.mrb[0].mxu1 }
 0x1fd   :  { %v240_v31 = vadd.f32 %v368_v29, %v239_v30  ;;  %v396_v32 = vpop.f32.mrb[1].mxu1 }
 0x1ff   :  { %v243_v33 = vmax.f32 %v240_v31, 0.0 }
 0x201   :  { %370 = vmatmul.mubr.msk.f32.vlgmr.msra.gmra.mrb[2].mxu0 %vm169_vm2, %v243_v33 }
 0x2d4   :  { %v333_v41 = vpop.f32.mrb[2].mxu0 }
 0x2d5   :  { %v334_v42 = vadd.f32 %v333_v41, %v257_v39  ;;  %v335_v43 = vpop.f32.mrb[3].mxu0 }
 0x2d6   :  { %v336_v44 = vadd.f32 %v335_v43, %v261_v40 }
 0x2d7   :  { %347 = vst [vmem:[#allocation10] sm:$0xff] %v334_v42 }
 0x2d8   :  { %338 = vmax.xlane.f32.xlu0 %v336_v44 }
 0x365   :  { %v339_v45 = vpop.xlane.xlu0 %338 }
 0x366   :  { %v340_v46 = vsub.f32 %v336_v44, %v339_v45 }
 0x368   :  { %v341_v47 = vmul.f32 1.442695, %v340_v46 }
 0x36a   :  { %426 = vpow2.f32 %v341_v47 }
 0x374   :  { %v427_v48 = vpop.eup %426 }
 0x375   :  { %343 = vadd.xlane.f32.xlu0 %v427_v48 }
 0x402   :  { %v344_v49 = vpop.xlane.xlu0 %343 }
 0x403   :  { %428 = vrcp.f32 %v344_v49 }
 0x40d   :  { %v429_v50 = vpop.eup %428 }
 0x40e   :  { %v346_v51 = vmul.f32 %v429_v50, %v427_v48 }
 0x410   :  { %348 = vst [vmem:[#allocation10 + $0x8] sm:$0xff] %v346_v51 }
 0x411   :  { %529 = shalt.err (!%p526_p8)
}
 0x412   :  { %s530_s29 = scalar_lea.hbm %s678_s6, 256 }
 0x413   :  { %p531_p9 = scmp.ne.s32.totalorder %s678_s6, %s530_s29  ;;  %p534_p10 = scmp.lt.u32.totalorder %s530_s29, %s678_s6 }
 0x415   :  { %p536_p11 = pnand %p534_p10, %p531_p9 }
 0x417   :  { %539 = shalt.err (!%p536_p11)
}
 0x418   :  { %358 = dma.vmem_to_hbm [thread:$0]  %s356_s26, 256, %s678_s6, [#allocation4]  }
 0x419   :  { %546 = dma.done.wait [#allocation4], 256  }
 0x41a   :  { %547 = vsyncadd [#allocation4], 4294967040 }
 0x41b   :  { %362 = vsyncpa [#allocation3], 1 }
 0x41c   :  { %363 = vsyncpa [#allocation6], 1 }
 0x41d   :  { %364 = vsyncpa [#allocation9], 1 }
 0x41e   :  { %365 = vsyncpa [#allocation4], 1 }

</bundles_post_ra>
